<compile_context>
chip_gen: v7x
topology: tpu7x:2x2x1
jax: 0.10.0
libtpu: 0.0.40
codegen_flags: <defaults>
</compile_context>

<pallas_src>
import jax
import jax.numpy as jnp
from jax.experimental import pallas as pl
from jax.experimental.pallas import tpu as pltpu

OUT_PAD = 128  # lane-dense output width


def actor_critic_kernel(x_ref, w_h_ref, w_out_ref, b_out_ref, out_ref):
    # Fused hidden layer (bias folded into W_h via the ones column in x):
    #   [pi1 | v1] = relu(x_aug @ [[W_pi1 | W_v1]; [b_pi1 | b_v1]])
    h = jnp.maximum(
        jnp.dot(x_ref[...], w_h_ref[...], preferred_element_type=jnp.float32),
        0.0)
    # Fused block-diagonal output heads -> lane-dense 128-wide slab.
    out_ref[...] = (
        jnp.dot(h, w_out_ref[...], preferred_element_type=jnp.float32)
        + b_out_ref[...])


def pack_params(p, out_pad=OUT_PAD, dtype=jnp.float32):
    """Fuse/pad per-branch weights into lane-dense kernel tensors.

    Returns:
      w_h   : (D + 1, 2H)  -- [W_pi1 | W_v1] with the bias row appended.
      w_out : (2H, out_pad) block-diagonal: cols [0:n_actions)=W_pi,
              col n_actions=W_v, rest zero (structural padding).
      b_out : (1, out_pad) packed output biases.
    """
    hidden = p["w_pi1"].shape[1]
    n_actions = p["w_pi"].shape[1]
    assert n_actions + 1 <= out_pad

    w_h = jnp.concatenate([p["w_pi1"], p["w_v1"]], axis=1)
    b_h = jnp.concatenate([p["b_pi1"], p["b_v1"]], axis=1)
    w_h = jnp.concatenate([w_h, b_h], axis=0).astype(dtype)

    w_out = jnp.zeros((2 * hidden, out_pad), dtype)
    w_out = w_out.at[:hidden, :n_actions].set(p["w_pi"].astype(dtype))
    w_out = w_out.at[hidden:, n_actions:n_actions + 1].set(
        p["w_v"].astype(dtype))

    b_out = jnp.zeros((1, out_pad), dtype)
    b_out = b_out.at[0, :n_actions].set(p["b_pi"][0].astype(dtype))
    b_out = b_out.at[0, n_actions].set(p["b_v"][0, 0].astype(dtype))

    return dict(w_h=w_h, w_out=w_out, b_out=b_out)


def _round_up(x, m):
    return ((x + m - 1) // m) * m


def actor_critic_forward(state, packed, n_actions, max_row_tile=256):
    """state: (B, D) float32. Returns (pi: (B, n_actions), v: (B, 1))."""
    B, D = state.shape
    d_aug, two_h = packed["w_h"].shape
    out_pad = packed["w_out"].shape[1]
    assert d_aug == D + 1

    # Fold hidden bias into the matmul: append a ones column.
    x = jnp.concatenate([state, jnp.ones((B, 1), state.dtype)], axis=1)

    # Row tile: multiple of 8 sublanes; large batches get gridded so both v7x
    # TensorCores are used and per-tile VMEM stays small on every generation.
    tb = min(max_row_tile, _round_up(B, 8))
    b_pad = _round_up(B, tb)
    if b_pad != B:
        x = jnp.pad(x, ((0, b_pad - B), (0, 0)))
    grid = (b_pad // tb,)

    flops = 2 * b_pad * d_aug * two_h + 2 * b_pad * two_h * out_pad
    bytes_accessed = 4 * (x.size + packed["w_h"].size + packed["w_out"].size
                          + packed["b_out"].size + b_pad * out_pad)

    out = pl.pallas_call(
        actor_critic_kernel,
        out_shape=jax.ShapeDtypeStruct((b_pad, out_pad), jnp.float32),
        grid=grid,
        in_specs=[
            pl.BlockSpec((tb, d_aug), lambda i: (i, 0)),
            # Weights/bias: constant index_maps -> resident across row tiles.
            pl.BlockSpec((d_aug, two_h), lambda i: (0, 0)),
            pl.BlockSpec((two_h, out_pad), lambda i: (0, 0)),
            pl.BlockSpec((1, out_pad), lambda i: (0, 0)),
        ],
        out_specs=pl.BlockSpec((tb, out_pad), lambda i: (i, 0)),
        compiler_params=pltpu.CompilerParams(
            dimension_semantics=("parallel",)),
        cost_estimate=pl.CostEstimate(flops=flops, transcendentals=0,
                                      bytes_accessed=bytes_accessed),
    )(x, packed["w_h"], packed["w_out"], packed["b_out"])

    pi = out[:B, :n_actions]
    v = out[:B, n_actions:n_actions + 1]
    return pi, v


def init_params(key, input_dims, n_actions, hidden=128):
    """PyTorch-Linear-style init (uniform +-1/sqrt(fan_in)).

    Weights stored transposed: (in_features, out_features)."""
    def linear(k, fan_in, fan_out):
        k_w, k_b = jax.random.split(k)
        bound = 1.0 / jnp.sqrt(fan_in)
        w = jax.random.uniform(k_w, (fan_in, fan_out), jnp.float32,
                               -bound, bound)
        b = jax.random.uniform(k_b, (1, fan_out), jnp.float32, -bound, bound)
        return w, b

    k1, k2, k3, k4 = jax.random.split(key, 4)
    w_pi1, b_pi1 = linear(k1, input_dims, hidden)
    w_v1, b_v1 = linear(k2, input_dims, hidden)
    w_pi, b_pi = linear(k3, hidden, n_actions)
    w_v, b_v = linear(k4, hidden, 1)
    return dict(w_pi1=w_pi1, b_pi1=b_pi1,
                w_v1=w_v1, b_v1=b_v1,
                w_pi=w_pi, b_pi=b_pi,
                w_v=w_v, b_v=b_v)


def reference_forward(state, p):
    """True-f32 reference (HIGHEST precision) for validation."""
    hp = jax.lax.Precision.HIGHEST
    pi1 = jnp.maximum(
        jnp.dot(state, p["w_pi1"], precision=hp) + p["b_pi1"], 0.0)
    v1 = jnp.maximum(
        jnp.dot(state, p["w_v1"], precision=hp) + p["b_v1"], 0.0)
    pi = jnp.dot(pi1, p["w_pi"], precision=hp) + p["b_pi"]
    v = jnp.dot(v1, p["w_v"], precision=hp) + p["b_v"]
    return pi, v


if __name__ == "__main__":
    key = jax.random.PRNGKey(0)
    k_state, k_state_big, k_params = jax.random.split(key, 3)

    input_dims = 8     # CartPole-like low-dim observation vector
    n_actions = 4
    hidden = 128

    params = init_params(k_params, input_dims, n_actions, hidden)
    packed = pack_params(params)

    # Kernel runs at default MXU precision (single bf16 pass on f32 operands);
    # tolerance below accounts for that against the true-f32 reference.
    TOL = dict(atol=2e-2, rtol=2e-2)

    # Case 1: small batch (single grid point).
    state = jax.random.normal(k_state, (8, input_dims), jnp.float32)
    pi, v = actor_critic_forward(state, packed, n_actions)
    jax.block_until_ready((pi, v))
    pi_ref, v_ref = reference_forward(state, params)
    assert pi.shape == (8, n_actions) and v.shape == (8, 1)
    assert jnp.allclose(pi, pi_ref, **TOL)
    assert jnp.allclose(v, v_ref, **TOL)

    # Case 2: larger batch exercising the row grid (padding + 2 tiles,
    # "parallel" semantics -> both TensorCores on v7x).
    state_big = jax.random.normal(k_state_big, (384, input_dims), jnp.float32)
    pi_b, v_b = actor_critic_forward(state_big, packed, n_actions)
    jax.block_until_ready((pi_b, v_b))
    pi_b_ref, v_b_ref = reference_forward(state_big, params)
    assert pi_b.shape == (384, n_actions) and v_b.shape == (384, 1)
    assert jnp.allclose(pi_b, pi_b_ref, **TOL)
    assert jnp.allclose(v_b, v_b_ref, **TOL)

    print("KERNEL_OK")
</pallas_src>

<mosaic_0001>
module attributes {stable_mosaic.version = 11 : i64} {
  func.func @actor_critic_kernel(%arg0: i32, %arg1: memref<8x9xf32, #tpu.memory_space<vmem>>, %arg2: memref<9x256xf32, #tpu.memory_space<vmem>>, %arg3: memref<256x128xf32, #tpu.memory_space<vmem>>, %arg4: memref<1x128xf32, #tpu.memory_space<vmem>>, %arg5: memref<8x128xf32, #tpu.memory_space<vmem>>) attributes {dimension_semantics = [#tpu.dimension_semantics<parallel>], iteration_bounds = array<i64: 1>, scalar_prefetch = 0 : i64, scratch_operands = 0 : i64, tpu.core_type = #tpu.core_type<tc>, window_params = [{transform_indices = @transform_0, window_bounds = array<i64: 8, 9>}, {pipeline_mode = #tpu.pipeline_mode<synchronous>, transform_indices = @transform_1, window_bounds = array<i64: 9, 256>}, {pipeline_mode = #tpu.pipeline_mode<synchronous>, transform_indices = @transform_2, window_bounds = array<i64: 256, 128>}, {pipeline_mode = #tpu.pipeline_mode<synchronous>, transform_indices = @transform_3, window_bounds = array<i64: 1, 128>}, {transform_indices = @transform_4, window_bounds = array<i64: 8, 128>}]} {
    %c0 = arith.constant 0 : index
    %c0_0 = arith.constant 0 : index
    %0 = vector.load %arg1[%c0, %c0_0] : memref<8x9xf32, #tpu.memory_space<vmem>>, vector<8x9xf32>
    %c0_1 = arith.constant 0 : index
    %c0_2 = arith.constant 0 : index
    %1 = vector.load %arg2[%c0_1, %c0_2] : memref<9x256xf32, #tpu.memory_space<vmem>>, vector<9x256xf32>
    %cst = arith.constant dense<0.000000e+00> : vector<8x256xf32>
    %2 = tpu.matmul %0, %1, %cst {dimension_numbers = #tpu.dot_dimension_numbers<[1], [0], [0], [1], [0, 0, 1, 1], [], []>} : vector<8x9xf32>, vector<9x256xf32>, vector<8x256xf32> -> vector<8x256xf32>
    %cst_3 = arith.constant 0.000000e+00 : f32
    %3 = vector.broadcast %cst_3 : f32 to vector<8x256xf32>
    %4 = arith.maximumf %2, %3 : vector<8x256xf32>
    %c0_4 = arith.constant 0 : index
    %c0_5 = arith.constant 0 : index
    %5 = vector.load %arg3[%c0_4, %c0_5] : memref<256x128xf32, #tpu.memory_space<vmem>>, vector<256x128xf32>
    %cst_6 = arith.constant dense<0.000000e+00> : vector<8x128xf32>
    %6 = tpu.matmul %4, %5, %cst_6 {dimension_numbers = #tpu.dot_dimension_numbers<[1], [0], [0], [1], [0, 0, 1, 1], [], []>} : vector<8x256xf32>, vector<256x128xf32>, vector<8x128xf32> -> vector<8x128xf32>
    %c0_7 = arith.constant 0 : index
    %c0_8 = arith.constant 0 : index
    %7 = vector.load %arg4[%c0_7, %c0_8] : memref<1x128xf32, #tpu.memory_space<vmem>>, vector<1x128xf32>
    %8 = vector.broadcast %7 : vector<1x128xf32> to vector<8x128xf32>
    %9 = arith.addf %6, %8 : vector<8x128xf32>
    %c0_9 = arith.constant 0 : index
    %c0_10 = arith.constant 0 : index
    %10 = vector.load %arg5[%c0_9, %c0_10] : memref<8x128xf32, #tpu.memory_space<vmem>>, vector<8x128xf32>
    tpu.vector_store %arg5[%c0_9, %c0_10], %9 {strides = array<i32>} : memref<8x128xf32, #tpu.memory_space<vmem>>, vector<8x128xf32>,
    return
  }
  func.func @transform_0(%arg0: i32) -> (i32, i32) {
    %c0_i32 = arith.constant 0 : i32
    %c0_i32_0 = arith.constant 0 : i32
    return %arg0, %c0_i32 : i32, i32
  }
  func.func @transform_1(%arg0: i32) -> (i32, i32) {
    %c0_i32 = arith.constant 0 : i32
    %c0_i32_0 = arith.constant 0 : i32
    %c0_i32_1 = arith.constant 0 : i32
    return %c0_i32, %c0_i32_0 : i32, i32
  }
  func.func @transform_2(%arg0: i32) -> (i32, i32) {
    %c0_i32 = arith.constant 0 : i32
    %c0_i32_0 = arith.constant 0 : i32
    %c0_i32_1 = arith.constant 0 : i32
    return %c0_i32, %c0_i32_0 : i32, i32
  }
  func.func @transform_3(%arg0: i32) -> (i32, i32) {
    %c0_i32 = arith.constant 0 : i32
    %c0_i32_0 = arith.constant 0 : i32
    %c0_i32_1 = arith.constant 0 : i32
    return %c0_i32, %c0_i32_0 : i32, i32
  }
  func.func @transform_4(%arg0: i32) -> (i32, i32) {
    %c0_i32 = arith.constant 0 : i32
    %c0_i32_0 = arith.constant 0 : i32
    return %arg0, %c0_i32 : i32, i32
  }
}

</mosaic_0001>

<bundles_post_ra>
// kernel: tpu_custom_call.1
= control target key start
LH: loop header
LB: loop body
LE: loop exit
PB: predicated region body
PF: predicated region fallthrough
CT: control target
= control target key end

     0   :  { %9 = vsyncpa [#allocation3], 0  ;;  %s547_s0 = inlined_call_operand.hbm [shape: f32[8,9], index: 0, kind: input, shape index: {}]   ;;  %s548_s1 = inlined_call_operand.hbm [shape: f32[9,256], index: 1, kind: input, shape index: {}]   ;;  %s549_s2 = inlined_call_operand.hbm [shape: f32[256,128], index: 2, kind: input, shape index: {}]   ;;  %s550_s3 = inlined_call_operand.vmem [shape: f32[1,128], index: 3, kind: input, shape index: {}]   ;;  %s551_s4 = inlined_call_operand.hbm [shape: f32[8,128], index: 4, kind: output, shape index: {}]  }
   0x1   :  { %10 = vsyncpa [#allocation6], 0 }
   0x2   :  { %11 = vsyncpa [#allocation4], 0  ;;  %s453_s15 = smov [#allocation5]   ;;  %s359_s19 = scalar_lea.hbm %s548_s1, 512 }
   0x3   :  { %s27_s16 = sshll.u32 %s453_s15, 4  ;;  %p360_p0 = scmp.ne.s32.totalorder %s548_s1, %s359_s19  ;;  %s28_s16 = int_to_ptr.vmem [resolvable:$true] %s27_s16 }
   0x4   :  { %p363_p1 = scmp.lt.u32.totalorder %s359_s19, %s548_s1 }
   0x6   :  { %p365_p2 = pnand %p363_p1, %p360_p0 }
   0x8   :  { %368 = shalt.err (!%p365_p2)
}
   0x9   :  { %s369_s24 = scalar_lea.vmem %s28_s16, 512  ;;  %p374_p4 = scmp.lt.s32.totalorder %s28_s16, %s28_s16 }
   0xa   :  { %p370_p3 = scmp.ne.s32.totalorder %s28_s16, %s369_s24  ;;  %p375_p5 = scmp.lt.s32.totalorder %s369_s24, %s369_s24 }
   0xc   :  { %p376_p6 = por %p375_p5, %p374_p4 }
   0xe   :  { %p377_p7 = pnand %p376_p6, %p370_p3 }
  0x10   :  { %380 = shalt.err (!%p377_p7)
}
  0x11   :  { %s454_s25 = smov 256   ;;  %s455_s26 = smov 16  }
  0x12   :  { %33 = dma.hbm_to_vmem [thread:$0]  %s548_s1, 512, %s28_s16, [#allocation6], %s454_s25, %s454_s25, %s455_s26  }
  0x13   :  { %s456_s29 = smov [#allocation2]   ;;  %s457_s5 = smov [#allocation7]  }
  0x14   :  { %s18_s30 = sshll.u32 %s456_s29, 4  ;;  %s39_s6 = sshll.u32 %s457_s5, 4  ;;  %s19_s30 = int_to_ptr.vmem [resolvable:$true] %s18_s30  ;;  %s40_s6 = int_to_ptr.vmem [resolvable:$true] %s39_s6 }
  0x15   :  { %s381_s9 = scalar_lea.hbm %s547_s0, 128 }
  0x16   :  { %p382_p8 = scmp.ne.s32.totalorder %s547_s0, %s381_s9  ;;  %p385_p9 = scmp.lt.u32.totalorder %s381_s9, %s547_s0 }
  0x18   :  { %p387_p10 = pnand %p385_p9, %p382_p8 }
  0x1a   :  { %390 = shalt.err (!%p387_p10)
}
  0x1b   :  { %s391_s1 = scalar_lea.vmem %s19_s30, 128  ;;  %p396_p12 = scmp.lt.s32.totalorder %s19_s30, %s19_s30 }
  0x1c   :  { %p392_p11 = scmp.ne.s32.totalorder %s19_s30, %s391_s1  ;;  %p397_p13 = scmp.lt.s32.totalorder %s391_s1, %s391_s1 }
  0x1e   :  { %p398_p0 = por %p397_p13, %p396_p12 }
  0x20   :  { %p399_p1 = pnand %p398_p0, %p392_p11 }
  0x22   :  { %402 = shalt.err (!%p399_p1)
}
  0x23   :  { %21 = dma.hbm_to_vmem [thread:$0]  %s547_s0, 128, %s19_s30, [#allocation3]  }
  0x24   :  { %s403_s18 = scalar_lea.hbm %s549_s2, 4096 }
  0x25   :  { %p404_p2 = scmp.ne.s32.totalorder %s549_s2, %s403_s18  ;;  %p407_p3 = scmp.lt.u32.totalorder %s403_s18, %s549_s2 }
  0x27   :  { %p409_p4 = pnand %p407_p3, %p404_p2 }
  0x29   :  { %412 = shalt.err (!%p409_p4)
}
  0x2a   :  { %s413_s23 = scalar_lea.vmem %s40_s6, 4096  ;;  %p418_p6 = scmp.lt.s32.totalorder %s40_s6, %s40_s6 }
  0x2b   :  { %p414_p5 = scmp.ne.s32.totalorder %s40_s6, %s413_s23  ;;  %p419_p7 = scmp.lt.s32.totalorder %s413_s23, %s413_s23 }
  0x2d   :  { %p420_p8 = por %p419_p7, %p418_p6 }
  0x2f   :  { %p421_p9 = pnand %p420_p8, %p414_p5 }
  0x31   :  { %424 = shalt.err (!%p421_p9)
}
  0x32   :  { %s458_s0 = smov 128   ;;  %s459_s24 = smov 8  }
  0x33   :  { %45 = dma.hbm_to_vmem [thread:$0]  %s549_s2, 4096, %s40_s6, [#allocation6], %s458_s0, %s458_s0, %s459_s24  }
  0x34   :  { %447 = dma.done.wait [#allocation3], 128  }
  0x35   :  { %448 = vsyncadd [#allocation3], 4294967168 }
  0x36   :  { %449 = dma.done.wait [#allocation6], 4608  }
  0x37   :  { %450 = vsyncadd [#allocation6], 4294962688  ;;  %v460_v0 = vmov 0.0   ;;  %vm66_vm0 = vcmask 1040384   ;;  %vm461_vm1 = vmmov 1   ;;  %v59_v2 = vld [vmem:[#allocation5 + $0x8] sm:$0xff] }
  0x38   :  { %137 = vmatprep.mubr.f32.mxu0 %v460_v0  ;;  %vm524_vm2 = vmpackc.low %vm66_vm0, %vm461_vm1  ;;  %v61_v3 = vld [vmem:[#allocation5 + $0x18] sm:$0x1]  ;;  %v58_v4 = vld [vmem:[#allocation5] sm:$0xff]  ;;  %vm62_vm3 = vcmask 72704   ;;  %s462_s28 = smov [#allocation8]  }
  0x39   :  { %v311_v5 = vpack.c.bf16 %v61_v3, %v59_v2  ;;  %v60_v6 = vld [vmem:[#allocation5 + $0x10] sm:$0x1]  ;;  %v162_v7 = vld [vmem:[#allocation7 + $0x80] sm:$0xff]  ;;  %v57_v9 = vld [vmem:[#allocation2] sm:$0xff]  ;;  %s262_s29 = sshll.u32 %s462_s28, 4  ;;  %s263_s29 = int_to_ptr.vmem [resolvable:$true] %s262_s29 }
  0x3a   :  { %v314_v8 = vpack.c.bf16 %v60_v6, %v58_v4  ;;  %v163_v10 = vld [vmem:[#allocation7 + $0x88] sm:$0xff]  ;;  %v146_v11 = vld [vmem:[#allocation7] sm:$0xff]  ;;  %v164_v15 = vld [vmem:[#allocation7 + $0x90] sm:$0xff]  ;;  %s425_s30 = scalar_lea.vmem %s263_s29, 128  ;;  %p430_p11 = scmp.lt.s32.totalorder %s263_s29, %s263_s29 }
  0x3b   :  { %v147_v12 = vld [vmem:[#allocation7 + $0x8] sm:$0xff]  ;;  %313 = vmatprep.subr.msk.bf16.mxu0 %vm524_vm2, %v311_v5  ;;  %v317_v13 = vpack.c.bf16 %v163_v10, %v162_v7  ;;  %v165_v16 = vld [vmem:[#allocation7 + $0x98] sm:$0xff]  ;;  %v148_v17 = vld [vmem:[#allocation7 + $0x10] sm:$0xff]  ;;  %p426_p10 = scmp.ne.s32.totalorder %s263_s29, %s425_s30  ;;  %p431_p12 = scmp.lt.s32.totalorder %s425_s30, %s425_s30 }
  0x3c   :  { %v319_v14 = vpack.c.bf16 %v147_v12, %v146_v11  ;;  %316 = vmatpush1.bf16.msk.msra.mxu0 %vm524_vm2, %v314_v8  ;;  %v321_v18 = vpack.c.bf16 %v165_v16, %v164_v15  ;;  %v149_v19 = vld [vmem:[#allocation7 + $0x18] sm:$0xff]  ;;  %v166_v20 = vld [vmem:[#allocation7 + $0xa0] sm:$0xff]  ;;  %v167_v21 = vld [vmem:[#allocation7 + $0xa8] sm:$0xff] }
  0x3d   :  { %318 = vmatprep.subr.bf16.mxu1 %v317_v13  ;;  %v323_v22 = vpack.c.bf16 %v149_v19, %v148_v17  ;;  %v325_v23 = vpack.c.bf16 %v167_v21, %v166_v20  ;;  %v150_v24 = vld [vmem:[#allocation7 + $0x20] sm:$0xff]  ;;  %v151_v25 = vld [vmem:[#allocation7 + $0x28] sm:$0xff]  ;;  %v168_v26 = vld [vmem:[#allocation7 + $0xb0] sm:$0xff]  ;;  %p432_p13 = por %p431_p12, %p430_p11 }
  0x3e   :  { %320 = vmatpush3.bf16.msra.mxu1 %v319_v14  ;;  %v169_v27 = vld [vmem:[#allocation7 + $0xb8] sm:$0xff]  ;;  %v327_v28 = vpack.c.bf16 %v151_v25, %v150_v24  ;;  %v152_v30 = vld [vmem:[#allocation7 + $0x30] sm:$0xff]  ;;  %v170_v32 = vld [vmem:[#allocation7 + $0xc0] sm:$0xff] }
  0x3f   :  { %274 = vmatmul.mubr.msk.f32.vlgmr.msra.gmra.mrb[0].mxu0 %vm62_vm3, %v57_v9  ;;  %322 = vmatprep.subr.bf16.mxu1 %v321_v18  ;;  %v329_v29 = vpack.c.bf16 %v169_v27, %v168_v26  ;;  %v153_v31 = vld [vmem:[#allocation7 + $0x38] sm:$0xff]  ;;  %v171_v33 = vld [vmem:[#allocation7 + $0xc8] sm:$0xff]  ;;  %v154_v36 = vld [vmem:[#allocation7 + $0x40] sm:$0xff]  ;;  %p433_p0 = pnand %p432_p13, %p426_p10 }
  0x40   :  { %v331_v34 = vpack.c.bf16 %v153_v31, %v152_v30  ;;  %v333_v35 = vpack.c.bf16 %v171_v33, %v170_v32  ;;  %v155_v37 = vld [vmem:[#allocation7 + $0x48] sm:$0xff]  ;;  %v172_v38 = vld [vmem:[#allocation7 + $0xd0] sm:$0xff]  ;;  %v173_v39 = vld [vmem:[#allocation7 + $0xd8] sm:$0xff] }
  0x41   :  { %v335_v40 = vpack.c.bf16 %v155_v37, %v154_v36  ;;  %v337_v41 = vpack.c.bf16 %v173_v39, %v172_v38  ;;  %v156_v42 = vld [vmem:[#allocation7 + $0x50] sm:$0xff]  ;;  %v157_v43 = vld [vmem:[#allocation7 + $0x58] sm:$0xff]  ;;  %v174_v44 = vld [vmem:[#allocation7 + $0xe0] sm:$0xff] }
  0x42   :  { %324 = vmatpush3.bf16.msra.mxu1 %v323_v22  ;;  %v175_v45 = vld [vmem:[#allocation7 + $0xe8] sm:$0xff]  ;;  %v339_v46 = vpack.c.bf16 %v157_v43, %v156_v42  ;;  %v158_v48 = vld [vmem:[#allocation7 + $0x60] sm:$0xff]  ;;  %v176_v51 = vld [vmem:[#allocation7 + $0xf0] sm:$0xff] }
  0x43   :  { %326 = vmatprep.subr.bf16.mxu1 %v325_v23  ;;  %v341_v47 = vpack.c.bf16 %v175_v45, %v174_v44  ;;  %v159_v49 = vld [vmem:[#allocation7 + $0x68] sm:$0xff]  ;;  %v177_v52 = vld [vmem:[#allocation7 + $0xf8] sm:$0xff]  ;;  %v160_v54 = vld [vmem:[#allocation7 + $0x70] sm:$0xff] }
  0x44   :  { %v343_v50 = vpack.c.bf16 %v159_v49, %v158_v48  ;;  %v345_v53 = vpack.c.bf16 %v177_v52, %v176_v51  ;;  %v161_v55 = vld [vmem:[#allocation7 + $0x78] sm:$0xff] }
  0x45   :  { %v347_v56 = vpack.c.bf16 %v161_v55, %v160_v54  ;;  %v275_v62 = vld [vmem:[%s550_s3] ss:$0 sm:$0xff] }
  0x46   :  { %328 = vmatpush3.bf16.msra.mxu1 %v327_v28 }
  0x47   :  { %330 = vmatprep.subr.bf16.mxu1 %v329_v29 }
  0x4a   :  { %332 = vmatpush3.bf16.msra.mxu1 %v331_v34 }
  0x4b   :  { %334 = vmatprep.subr.bf16.mxu1 %v333_v35 }
  0x4e   :  { %336 = vmatpush3.bf16.msra.mxu1 %v335_v40 }
  0x4f   :  { %338 = vmatprep.subr.bf16.mxu1 %v337_v41 }
  0x52   :  { %340 = vmatpush3.bf16.msra.mxu1 %v339_v46 }
  0x53   :  { %342 = vmatprep.subr.bf16.mxu1 %v341_v47 }
  0x56   :  { %344 = vmatpush3.bf16.msra.mxu1 %v343_v50 }
  0x57   :  { %346 = vmatprep.subr.bf16.mxu1 %v345_v53 }
  0x5a   :  { %348 = vmatpush3.bf16.msra.mxu1 %v347_v56 }
 0x112   :  { %v139_v57 = vpop.f32.mrb[0].mxu0 }
 0x113   :  { %v141_v58 = vpop.f32.mrb[1].mxu0  ;;  %v144_v60 = vmax.f32 %v139_v57, 0.0 }
 0x114   :  { %v145_v59 = vmax.f32 %v141_v58, 0.0 }
 0x116   :  { %249 = vmatprep.mubr.f32.mxu1 %v145_v59 }
 0x117   :  { %250 = vmatmul.mubr.f32.vlgmr.msra.gmra.mrb[0].mxu1 %v144_v60 }
 0x1ea   :  { %v308_v61 = vpop.f32.mrb[0].mxu1 }
 0x1eb   :  { %v309_v63 = vpop.f32.mrb[1].mxu1 }
 0x1ec   :  { %v310_v0 = vadd.f32 %v309_v63, %v308_v61 }
 0x1ee   :  { %v252_v1 = vadd.f32 %v310_v0, %v275_v62 }
 0x1f0   :  { %255 = vst [vmem:[#allocation8] sm:$0xff] %v252_v1 }
 0x1f1   :  { %436 = shalt.err (!%p433_p0)
}
 0x1f2   :  { %s437_s7 = scalar_lea.hbm %s551_s4, 128 }
 0x1f3   :  { %p438_p1 = scmp.ne.s32.totalorder %s551_s4, %s437_s7  ;;  %p441_p2 = scmp.lt.u32.totalorder %s437_s7, %s551_s4 }
 0x1f5   :  { %p443_p3 = pnand %p441_p2, %p438_p1 }
 0x1f7   :  { %446 = shalt.err (!%p443_p3)
}
 0x1f8   :  { %265 = dma.vmem_to_hbm [thread:$0]  %s263_s29, 128, %s551_s4, [#allocation4]  }
 0x1f9   :  { %451 = dma.done.wait [#allocation4], 128  }
 0x1fa   :  { %452 = vsyncadd [#allocation4], 4294967168 }
 0x1fb   :  { %269 = vsyncpa [#allocation3], 1 }
 0x1fc   :  { %270 = vsyncpa [#allocation6], 1 }
 0x1fd   :  { %271 = vsyncpa [#allocation4], 1 }

</bundles_post_ra>
